<compile_context>
chip_gen: v5e
topology: v5e:2x2
jax: 0.10.0
libtpu: 0.0.40
codegen_flags: <defaults>
</compile_context>

<pallas_src>
import functools

import jax
import jax.numpy as jnp
from jax.experimental import pallas as pl
from jax.experimental.pallas import tpu as pltpu

_LANE = 128      # lane width (last dim)
_SUBLANE = 8     # sublane width (second-to-last dim)


def _round_up(x, m):
    return (x + m - 1) // m * m


# ----------------------------------------------------------------------------
# Fused decoder kernel: y = Linear_L(act(... act(Linear_1(x)) ...))
# ----------------------------------------------------------------------------
def _fused_decoder_kernel(*refs, num_layers, negative_slope):
    # refs = (x_ref, w0_ref, b0_ref, w1_ref, b1_ref, ..., o_ref)
    x_ref = refs[0]
    o_ref = refs[-1]
    wb_refs = refs[1:-1]

    h = x_ref[...].astype(jnp.float32)           # (TB, D0)
    for layer in range(num_layers):              # statically unrolled
        w = wb_refs[2 * layer][...]              # (D_in, D_out)
        b = wb_refs[2 * layer + 1][...]          # (1, D_out)
        h = jnp.dot(h, w, preferred_element_type=jnp.float32) + b
        if layer < num_layers - 1:
            # LeakyReLU(negative_slope); negative_slope == 0.0 -> plain ReLU.
            h = jnp.where(h > 0, h, negative_slope * h)
    o_ref[...] = h.astype(o_ref.dtype)


# ----------------------------------------------------------------------------
# Parameters (mirrors nn.Linear init; weights stored as (in, out))
# ----------------------------------------------------------------------------
def init_decoder_params(key, input_dim, layer_dim, latent_dim, num_layers):
    dims = []
    for i in range(num_layers - 1):
        in_d = latent_dim if i == 0 else layer_dim
        dims.append((in_d, layer_dim))
    dims.append((layer_dim, input_dim))          # self.final

    params = []
    for (fan_in, fan_out) in dims:
        key, kw, kb = jax.random.split(key, 3)
        bound = 1.0 / jnp.sqrt(fan_in)
        w = jax.random.uniform(kw, (fan_in, fan_out), jnp.float32, -bound, bound)
        b = jax.random.uniform(kb, (fan_out,), jnp.float32, -bound, bound)
        params.append((w, b))
    return params


# ----------------------------------------------------------------------------
# Forward: one fused pallas_call for the whole decoder
# ----------------------------------------------------------------------------
def decoder_forward(params, x, activation="lrelu"):
    """params: [(w, b), ...] with w=(in,out); x: (B, latent_dim) f32."""
    ns = 0.2 if activation == "lrelu" else 0.0   # ReLU == LeakyReLU(0.0)
    num_layers = len(params)

    B, in_dim = x.shape
    assert in_dim == params[0][0].shape[0]
    out_dim = params[-1][0].shape[1]

    # --- lane-dense feature padding (multiples of 128) ----------------------
    dims = [in_dim] + [w.shape[1] for (w, _) in params]
    dims_p = [_round_up(d, _LANE) for d in dims]

    padded_wb = []
    for li, (w, b) in enumerate(params):
        ip, op = dims_p[li], dims_p[li + 1]
        w_p = jnp.zeros((ip, op), jnp.float32).at[: w.shape[0], : w.shape[1]].set(w)
        b_p = jnp.zeros((1, op), jnp.float32).at[0, : b.shape[0]].set(b)
        padded_wb.append((w_p, b_p))

    # --- batch padding / tiling ---------------------------------------------
    B_p = _round_up(B, _SUBLANE)
    if B_p >= _LANE:
        TB = _LANE
        B_p = _round_up(B, _LANE)
    else:
        TB = B_p
    x_p = jnp.zeros((B_p, dims_p[0]), jnp.float32).at[:B, :in_dim].set(x)
    grid = (B_p // TB,)

    # --- specs ----------------------------------------------------------------
    in_specs = [pl.BlockSpec((TB, dims_p[0]), lambda i: (i, 0),
                             memory_space=pltpu.VMEM)]
    flat_wb = []
    for li, (w_p, b_p) in enumerate(padded_wb):
        in_specs.append(pl.BlockSpec(w_p.shape, lambda i: (0, 0),
                                     memory_space=pltpu.VMEM))
        in_specs.append(pl.BlockSpec(b_p.shape, lambda i: (0, 0),
                                     memory_space=pltpu.VMEM))
        flat_wb.extend([w_p, b_p])

    out_specs = pl.BlockSpec((TB, dims_p[-1]), lambda i: (i, 0),
                             memory_space=pltpu.VMEM)

    kernel = functools.partial(_fused_decoder_kernel,
                               num_layers=num_layers, negative_slope=ns)

    out_p = pl.pallas_call(
        kernel,
        out_shape=jax.ShapeDtypeStruct((B_p, dims_p[-1]), jnp.float32),
        grid=grid,
        in_specs=in_specs,
        out_specs=out_specs,
        compiler_params=pltpu.CompilerParams(
            dimension_semantics=("parallel",)),   # v7x: shard batch across 2 TCs
    )(x_p, *flat_wb)

    return out_p[:B, :out_dim]


def decoder_forward_ref(params, x, activation="lrelu"):
    """Pure-JAX reference for correctness."""
    ns = 0.2 if activation == "lrelu" else 0.0
    for (w, b) in params[:-1]:
        x = x @ w + b
        x = jnp.where(x > 0, x, ns * x)
    w, b = params[-1]
    return x @ w + b


# ----------------------------------------------------------------------------
if __name__ == "__main__":
    # Small shapes consistent with the module's forward.
    batch = 8
    latent_dim = 32
    layer_dim = 128
    input_dim = 64
    num_layers = 3
    activation = "lrelu"

    key = jax.random.PRNGKey(0)
    key_x, key_p = jax.random.split(key)
    x = jax.random.normal(key_x, (batch, latent_dim), jnp.float32)

    params = init_decoder_params(key_p, input_dim, layer_dim, latent_dim, num_layers)

    out = decoder_forward(params, x, activation)
    out = jax.block_until_ready(out)

    ref = decoder_forward_ref(params, x, activation)
    assert out.shape == (batch, input_dim)
    assert jnp.allclose(out, ref, atol=1e-4, rtol=1e-4)

    # Also exercise the batch-tiled (grid > 1) path + ReLU variant.
    big_batch = 256
    xb = jax.random.normal(jax.random.PRNGKey(1), (big_batch, latent_dim), jnp.float32)
    out_b = jax.block_until_ready(decoder_forward(params, xb, "relu"))
    ref_b = decoder_forward_ref(params, xb, "relu")
    assert out_b.shape == (big_batch, input_dim)
    assert jnp.allclose(out_b, ref_b, atol=1e-4, rtol=1e-4)

    print("KERNEL_OK")
</pallas_src>

<mosaic_0001>
module attributes {stable_mosaic.version = 11 : i64} {
  func.func @_fused_decoder_kernel(%arg0: i32, %arg1: memref<8x128xf32, #tpu.memory_space<vmem>>, %arg2: memref<128x128xf32, #tpu.memory_space<vmem>>, %arg3: memref<1x128xf32, #tpu.memory_space<vmem>>, %arg4: memref<128x128xf32, #tpu.memory_space<vmem>>, %arg5: memref<1x128xf32, #tpu.memory_space<vmem>>, %arg6: memref<128x128xf32, #tpu.memory_space<vmem>>, %arg7: memref<1x128xf32, #tpu.memory_space<vmem>>, %arg8: memref<8x128xf32, #tpu.memory_space<vmem>>) attributes {dimension_semantics = [#tpu.dimension_semantics<parallel>], iteration_bounds = array<i64: 1>, scalar_prefetch = 0 : i64, scratch_operands = 0 : i64, tpu.core_type = #tpu.core_type<tc>, window_params = [{transform_indices = @transform_0, window_bounds = array<i64: 8, 128>}, {pipeline_mode = #tpu.pipeline_mode<synchronous>, transform_indices = @transform_1, window_bounds = array<i64: 128, 128>}, {pipeline_mode = #tpu.pipeline_mode<synchronous>, transform_indices = @transform_2, window_bounds = array<i64: 1, 128>}, {pipeline_mode = #tpu.pipeline_mode<synchronous>, transform_indices = @transform_3, window_bounds = array<i64: 128, 128>}, {pipeline_mode = #tpu.pipeline_mode<synchronous>, transform_indices = @transform_4, window_bounds = array<i64: 1, 128>}, {pipeline_mode = #tpu.pipeline_mode<synchronous>, transform_indices = @transform_5, window_bounds = array<i64: 128, 128>}, {pipeline_mode = #tpu.pipeline_mode<synchronous>, transform_indices = @transform_6, window_bounds = array<i64: 1, 128>}, {transform_indices = @transform_7, window_bounds = array<i64: 8, 128>}]} {
    %c0 = arith.constant 0 : index
    %c0_0 = arith.constant 0 : index
    %0 = vector.load %arg1[%c0, %c0_0] : memref<8x128xf32, #tpu.memory_space<vmem>>, vector<8x128xf32>
    %c0_1 = arith.constant 0 : index
    %c0_2 = arith.constant 0 : index
    %1 = vector.load %arg2[%c0_1, %c0_2] : memref<128x128xf32, #tpu.memory_space<vmem>>, vector<128x128xf32>
    %c0_3 = arith.constant 0 : index
    %c0_4 = arith.constant 0 : index
    %2 = vector.load %arg3[%c0_3, %c0_4] : memref<1x128xf32, #tpu.memory_space<vmem>>, vector<1x128xf32>
    %cst = arith.constant dense<0.000000e+00> : vector<8x128xf32>
    %3 = tpu.matmul %0, %1, %cst {dimension_numbers = #tpu.dot_dimension_numbers<[1], [0], [0], [1], [0, 0, 1, 1], [], []>} : vector<8x128xf32>, vector<128x128xf32>, vector<8x128xf32> -> vector<8x128xf32>
    %4 = vector.broadcast %2 : vector<1x128xf32> to vector<8x128xf32>
    %5 = arith.addf %3, %4 : vector<8x128xf32>
    %cst_5 = arith.constant 0.000000e+00 : f32
    %6 = vector.broadcast %cst_5 : f32 to vector<8x128xf32>
    %7 = arith.cmpf ogt, %5, %6 : vector<8x128xf32>
    %cst_6 = arith.constant 2.000000e-01 : f32
    %8 = vector.broadcast %cst_6 : f32 to vector<8x128xf32>
    %9 = arith.mulf %8, %5 : vector<8x128xf32>
    %10 = arith.select %7, %5, %9 : vector<8x128xi1>, vector<8x128xf32>
    %c0_7 = arith.constant 0 : index
    %c0_8 = arith.constant 0 : index
    %11 = vector.load %arg4[%c0_7, %c0_8] : memref<128x128xf32, #tpu.memory_space<vmem>>, vector<128x128xf32>
    %c0_9 = arith.constant 0 : index
    %c0_10 = arith.constant 0 : index
    %12 = vector.load %arg5[%c0_9, %c0_10] : memref<1x128xf32, #tpu.memory_space<vmem>>, vector<1x128xf32>
    %cst_11 = arith.constant dense<0.000000e+00> : vector<8x128xf32>
    %13 = tpu.matmul %10, %11, %cst_11 {dimension_numbers = #tpu.dot_dimension_numbers<[1], [0], [0], [1], [0, 0, 1, 1], [], []>} : vector<8x128xf32>, vector<128x128xf32>, vector<8x128xf32> -> vector<8x128xf32>
    %14 = vector.broadcast %12 : vector<1x128xf32> to vector<8x128xf32>
    %15 = arith.addf %13, %14 : vector<8x128xf32>
    %cst_12 = arith.constant 0.000000e+00 : f32
    %16 = vector.broadcast %cst_12 : f32 to vector<8x128xf32>
    %17 = arith.cmpf ogt, %15, %16 : vector<8x128xf32>
    %cst_13 = arith.constant 2.000000e-01 : f32
    %18 = vector.broadcast %cst_13 : f32 to vector<8x128xf32>
    %19 = arith.mulf %18, %15 : vector<8x128xf32>
    %20 = arith.select %17, %15, %19 : vector<8x128xi1>, vector<8x128xf32>
    %c0_14 = arith.constant 0 : index
    %c0_15 = arith.constant 0 : index
    %21 = vector.load %arg6[%c0_14, %c0_15] : memref<128x128xf32, #tpu.memory_space<vmem>>, vector<128x128xf32>
    %c0_16 = arith.constant 0 : index
    %c0_17 = arith.constant 0 : index
    %22 = vector.load %arg7[%c0_16, %c0_17] : memref<1x128xf32, #tpu.memory_space<vmem>>, vector<1x128xf32>
    %cst_18 = arith.constant dense<0.000000e+00> : vector<8x128xf32>
    %23 = tpu.matmul %20, %21, %cst_18 {dimension_numbers = #tpu.dot_dimension_numbers<[1], [0], [0], [1], [0, 0, 1, 1], [], []>} : vector<8x128xf32>, vector<128x128xf32>, vector<8x128xf32> -> vector<8x128xf32>
    %24 = vector.broadcast %22 : vector<1x128xf32> to vector<8x128xf32>
    %25 = arith.addf %23, %24 : vector<8x128xf32>
    %c0_19 = arith.constant 0 : index
    %c0_20 = arith.constant 0 : index
    %26 = vector.load %arg8[%c0_19, %c0_20] : memref<8x128xf32, #tpu.memory_space<vmem>>, vector<8x128xf32>
    tpu.vector_store %arg8[%c0_19, %c0_20], %25 {strides = array<i32>} : memref<8x128xf32, #tpu.memory_space<vmem>>, vector<8x128xf32>,
    return
  }
  func.func @transform_0(%arg0: i32) -> (i32, i32) {
    %c0_i32 = arith.constant 0 : i32
    %c0_i32_0 = arith.constant 0 : i32
    return %arg0, %c0_i32 : i32, i32
  }
  func.func @transform_1(%arg0: i32) -> (i32, i32) {
    %c0_i32 = arith.constant 0 : i32
    %c0_i32_0 = arith.constant 0 : i32
    %c0_i32_1 = arith.constant 0 : i32
    return %c0_i32, %c0_i32_0 : i32, i32
  }
  func.func @transform_2(%arg0: i32) -> (i32, i32) {
    %c0_i32 = arith.constant 0 : i32
    %c0_i32_0 = arith.constant 0 : i32
    %c0_i32_1 = arith.constant 0 : i32
    return %c0_i32, %c0_i32_0 : i32, i32
  }
  func.func @transform_3(%arg0: i32) -> (i32, i32) {
    %c0_i32 = arith.constant 0 : i32
    %c0_i32_0 = arith.constant 0 : i32
    %c0_i32_1 = arith.constant 0 : i32
    return %c0_i32, %c0_i32_0 : i32, i32
  }
  func.func @transform_4(%arg0: i32) -> (i32, i32) {
    %c0_i32 = arith.constant 0 : i32
    %c0_i32_0 = arith.constant 0 : i32
    %c0_i32_1 = arith.constant 0 : i32
    return %c0_i32, %c0_i32_0 : i32, i32
  }
  func.func @transform_5(%arg0: i32) -> (i32, i32) {
    %c0_i32 = arith.constant 0 : i32
    %c0_i32_0 = arith.constant 0 : i32
    %c0_i32_1 = arith.constant 0 : i32
    return %c0_i32, %c0_i32_0 : i32, i32
  }
  func.func @transform_6(%arg0: i32) -> (i32, i32) {
    %c0_i32 = arith.constant 0 : i32
    %c0_i32_0 = arith.constant 0 : i32
    %c0_i32_1 = arith.constant 0 : i32
    return %c0_i32, %c0_i32_0 : i32, i32
  }
  func.func @transform_7(%arg0: i32) -> (i32, i32) {
    %c0_i32 = arith.constant 0 : i32
    %c0_i32_0 = arith.constant 0 : i32
    return %arg0, %c0_i32 : i32, i32
  }
}

</mosaic_0001>

<bundles_post_ra>
// kernel: tpu_custom_call.1
= control target key start
LH: loop header
LB: loop body
LE: loop exit
PB: predicated region body
PF: predicated region fallthrough
CT: control target
= control target key end

     0   :  { %12 = vsyncpa [#allocation3], 0  ;;  %s444_s0 = inlined_call_operand.hbm [shape: f32[8,128], index: 0, kind: input, shape index: {}]   ;;  %s445_s1 = inlined_call_operand.hbm [shape: f32[128,128], index: 1, kind: input, shape index: {}]   ;;  %s446_s2 = inlined_call_operand.vmem [shape: f32[1,128], index: 2, kind: input, shape index: {}]   ;;  %s447_s3 = inlined_call_operand.hbm [shape: f32[128,128], index: 3, kind: input, shape index: {}]   ;;  %s448_s4 = inlined_call_operand.vmem [shape: f32[1,128], index: 4, kind: input, shape index: {}]   ;;  %s449_s5 = inlined_call_operand.hbm [shape: f32[128,128], index: 5, kind: input, shape index: {}]   ;;  %s450_s6 = inlined_call_operand.vmem [shape: f32[1,128], index: 6, kind: input, shape index: {}]   ;;  %s451_s7 = inlined_call_operand.hbm [shape: f32[8,128], index: 7, kind: output, shape index: {}]  }
   0x1   :  { %13 = vsyncpa [#allocation6], 0 }
   0x2   :  { %14 = vsyncpa [#allocation9], 0  ;;  %s31_s26 = sshll.u32 %s445_s1, 4  ;;  %s32_s26 = int_to_ptr.hbm [resolvable:$true] %s31_s26 }
   0x3   :  { %15 = vsyncpa [#allocation4], 0  ;;  %s373_s27 = smov [#allocation5]   ;;  %s21_s8 = sshll.u32 %s444_s0, 4  ;;  %s22_s8 = int_to_ptr.hbm [resolvable:$true] %s21_s8 }
   0x4   :  { %s33_s28 = sshll.u32 %s373_s27, 4  ;;  %s374_s9 = smov 128   ;;  %s34_s28 = int_to_ptr.vmem [resolvable:$true] %s33_s28 }
   0x5   :  { %s375_s10 = smov 8   ;;  %s376_s11 = smov [#allocation2]  }
   0x6   :  { %39 = dma.hbm_to_vmem [thread:$0]  %s32_s26, 2048, %s34_s28, [#allocation6], %s374_s9, %s374_s9, %s375_s10  }
   0x7   :  { %s23_s12 = sshll.u32 %s376_s11, 4  ;;  %s46_s15 = sshll.u32 %s447_s3, 4  ;;  %s24_s12 = int_to_ptr.vmem [resolvable:$true] %s23_s12  ;;  %s47_s15 = int_to_ptr.hbm [resolvable:$true] %s46_s15 }
   0x8   :  { %26 = dma.hbm_to_vmem [thread:$0]  %s22_s8, 128, %s24_s12, [#allocation3]  }
   0x9   :  { %s61_s17 = sshll.u32 %s449_s5, 4  ;;  %s377_s18 = smov [#allocation7]   ;;  %s62_s17 = int_to_ptr.hbm [resolvable:$true] %s61_s17 }
   0xa   :  { %s48_s19 = sshll.u32 %s377_s18, 4  ;;  %s378_s0 = smov [#allocation8]   ;;  %s49_s19 = int_to_ptr.vmem [resolvable:$true] %s48_s19 }
   0xb   :  { %54 = dma.hbm_to_vmem [thread:$0]  %s47_s15, 2048, %s49_s19, [#allocation6], %s374_s9, %s374_s9, %s375_s10  }
   0xc   :  { %s63_s20 = sshll.u32 %s378_s0, 4  ;;  %s64_s20 = int_to_ptr.vmem [resolvable:$true] %s63_s20 }
   0xd   :  { %69 = dma.hbm_to_vmem [thread:$0]  %s62_s17, 2048, %s64_s20, [#allocation9], %s374_s9, %s374_s9, %s375_s10  }
   0xe   :  { %365 = dma.done.wait [#allocation3], 128  }
   0xf   :  { %366 = vsyncadd [#allocation3], 4294967168 }
  0x10   :  { %367 = dma.done.wait [#allocation6], 4096  }
  0x11   :  { %368 = vsyncadd [#allocation6], 4294963200 }
  0x12   :  { %369 = dma.done.wait [#allocation9], 2048  }
  0x13   :  { %370 = vsyncadd [#allocation9], 4294965248  ;;  %v104_v0 = vld [vmem:[#allocation5 + $0x78] sm:$0xff]  ;;  %v103_v1 = vld [vmem:[#allocation5 + $0x70] sm:$0xff]  ;;  %s379_s24 = smov [#allocation10]   ;;  %s223_s28 = sshll.u32 %s451_s7, 4  ;;  %s224_s28 = int_to_ptr.hbm [resolvable:$true] %s223_s28 }
  0x14   :  { %109 = vmatpush.msra.mxu0 %v104_v0  ;;  %v102_v2 = vld [vmem:[#allocation5 + $0x68] sm:$0xff]  ;;  %v101_v3 = vld [vmem:[#allocation5 + $0x60] sm:$0xff]  ;;  %v147_v4 = vld [vmem:[#allocation7 + $0x78] sm:$0xff]  ;;  %s221_s25 = sshll.u32 %s379_s24, 4  ;;  %s222_s25 = int_to_ptr.vmem [resolvable:$true] %s221_s25 }
  0x15   :  { %v100_v5 = vld [vmem:[#allocation5 + $0x58] sm:$0xff]  ;;  %152 = vmatpush.msra.mxu1 %v147_v4  ;;  %v146_v6 = vld [vmem:[#allocation7 + $0x70] sm:$0xff]  ;;  %v145_v7 = vld [vmem:[#allocation7 + $0x68] sm:$0xff] }
  0x16   :  { %110 = vmatpush.msra.mxu0 %v103_v1  ;;  %v99_v8 = vld [vmem:[#allocation5 + $0x50] sm:$0xff]  ;;  %v144_v9 = vld [vmem:[#allocation7 + $0x60] sm:$0xff]  ;;  %v98_v10 = vld [vmem:[#allocation5 + $0x48] sm:$0xff] }
  0x17   :  { %153 = vmatpush.msra.mxu1 %v146_v6  ;;  %v143_v11 = vld [vmem:[#allocation7 + $0x58] sm:$0xff]  ;;  %v97_v12 = vld [vmem:[#allocation5 + $0x40] sm:$0xff]  ;;  %v142_v13 = vld [vmem:[#allocation7 + $0x50] sm:$0xff] }
  0x18   :  { %111 = vmatpush.msra.mxu0 %v102_v2  ;;  %v96_v14 = vld [vmem:[#allocation5 + $0x38] sm:$0xff]  ;;  %v141_v15 = vld [vmem:[#allocation7 + $0x48] sm:$0xff]  ;;  %v95_v16 = vld [vmem:[#allocation5 + $0x30] sm:$0xff] }
  0x19   :  { %154 = vmatpush.msra.mxu1 %v145_v7  ;;  %v140_v17 = vld [vmem:[#allocation7 + $0x40] sm:$0xff]  ;;  %v94_v18 = vld [vmem:[#allocation5 + $0x28] sm:$0xff]  ;;  %v139_v19 = vld [vmem:[#allocation7 + $0x38] sm:$0xff] }
  0x1a   :  { %112 = vmatpush.msra.mxu0 %v101_v3  ;;  %v93_v20 = vld [vmem:[#allocation5 + $0x20] sm:$0xff]  ;;  %v138_v21 = vld [vmem:[#allocation7 + $0x30] sm:$0xff]  ;;  %v92_v22 = vld [vmem:[#allocation5 + $0x18] sm:$0xff] }
  0x1b   :  { %155 = vmatpush.msra.mxu1 %v144_v9  ;;  %v137_v23 = vld [vmem:[#allocation7 + $0x28] sm:$0xff]  ;;  %v91_v24 = vld [vmem:[#allocation5 + $0x10] sm:$0xff]  ;;  %v136_v25 = vld [vmem:[#allocation7 + $0x20] sm:$0xff] }
  0x1c   :  { %113 = vmatpush.msra.mxu0 %v100_v5  ;;  %v90_v26 = vld [vmem:[#allocation5 + $0x8] sm:$0xff]  ;;  %v135_v27 = vld [vmem:[#allocation7 + $0x18] sm:$0xff]  ;;  %v89_v28 = vld [vmem:[#allocation5] sm:$0xff] }
  0x1d   :  { %156 = vmatpush.msra.mxu1 %v143_v11  ;;  %v88_v29 = vld [vmem:[#allocation2] sm:$0xff]  ;;  %v134_v30 = vld [vmem:[#allocation7 + $0x10] sm:$0xff]  ;;  %v133_v31 = vld [vmem:[#allocation7 + $0x8] sm:$0xff] }
  0x1e   :  { %114 = vmatpush.msra.mxu0 %v99_v8  ;;  %v132_v32 = vld [vmem:[#allocation7] sm:$0xff]  ;;  %v190_v33 = vld [vmem:[#allocation8 + $0x78] sm:$0xff]  ;;  %v189_v34 = vld [vmem:[#allocation8 + $0x70] sm:$0xff] }
  0x1f   :  { %157 = vmatpush.msra.mxu1 %v142_v13  ;;  %195 = vmatpush.msra.mxu2 %v190_v33  ;;  %v188_v35 = vld [vmem:[#allocation8 + $0x68] sm:$0xff]  ;;  %v187_v36 = vld [vmem:[#allocation8 + $0x60] sm:$0xff]  ;;  %v186_v37 = vld [vmem:[#allocation8 + $0x58] sm:$0xff] }
  0x20   :  { %115 = vmatpush.msra.mxu0 %v98_v10  ;;  %v185_v38 = vld [vmem:[#allocation8 + $0x50] sm:$0xff]  ;;  %v184_v39 = vld [vmem:[#allocation8 + $0x48] sm:$0xff]  ;;  %v183_v40 = vld [vmem:[#allocation8 + $0x40] sm:$0xff] }
  0x21   :  { %158 = vmatpush.msra.mxu1 %v141_v15  ;;  %196 = vmatpush.msra.mxu2 %v189_v34  ;;  %v182_v41 = vld [vmem:[#allocation8 + $0x38] sm:$0xff]  ;;  %v181_v42 = vld [vmem:[#allocation8 + $0x30] sm:$0xff]  ;;  %v180_v43 = vld [vmem:[#allocation8 + $0x28] sm:$0xff] }
  0x22   :  { %116 = vmatpush.msra.mxu0 %v97_v12  ;;  %v179_v44 = vld [vmem:[#allocation8 + $0x20] sm:$0xff]  ;;  %v178_v45 = vld [vmem:[#allocation8 + $0x18] sm:$0xff]  ;;  %v177_v51 = vld [vmem:[#allocation8 + $0x10] sm:$0xff] }
  0x23   :  { %159 = vmatpush.msra.mxu1 %v140_v17  ;;  %197 = vmatpush.msra.mxu2 %v188_v35  ;;  %v242_v46 = vld [vmem:[%s446_s2] ss:$0 sm:$0xff]  ;;  %v176_v52 = vld [vmem:[#allocation8 + $0x8] sm:$0xff]  ;;  %v175_v53 = vld [vmem:[#allocation8] sm:$0xff] }
  0x24   :  { %117 = vmatpush.msra.mxu0 %v96_v14  ;;  %v243_v54 = vld [vmem:[%s448_s4] ss:$0 sm:$0xff] }
  0x25   :  { %160 = vmatpush.msra.mxu1 %v139_v19  ;;  %198 = vmatpush.msra.mxu2 %v187_v36  ;;  %v244_v59 = vld [vmem:[%s450_s6] ss:$0 sm:$0xff] }
  0x26   :  { %118 = vmatpush.msra.mxu0 %v95_v16 }
  0x27   :  { %161 = vmatpush.msra.mxu1 %v138_v21  ;;  %199 = vmatpush.msra.mxu2 %v186_v37 }
  0x28   :  { %119 = vmatpush.msra.mxu0 %v94_v18 }
  0x29   :  { %162 = vmatpush.msra.mxu1 %v137_v23  ;;  %200 = vmatpush.msra.mxu2 %v185_v38 }
  0x2a   :  { %120 = vmatpush.msra.mxu0 %v93_v20 }
  0x2b   :  { %163 = vmatpush.msra.mxu1 %v136_v25  ;;  %201 = vmatpush.msra.mxu2 %v184_v39 }
  0x2c   :  { %121 = vmatpush.msra.mxu0 %v92_v22 }
  0x2d   :  { %164 = vmatpush.msra.mxu1 %v135_v27  ;;  %202 = vmatpush.msra.mxu2 %v183_v40 }
  0x2e   :  { %122 = vmatpush.msra.mxu0 %v91_v24 }
  0x2f   :  { %165 = vmatpush.msra.mxu1 %v134_v30  ;;  %203 = vmatpush.msra.mxu2 %v182_v41 }
  0x30   :  { %123 = vmatpush.msra.mxu0 %v90_v26 }
  0x31   :  { %166 = vmatpush.msra.mxu1 %v133_v31  ;;  %204 = vmatpush.msra.mxu2 %v181_v42 }
  0x32   :  { %124 = vmatpush.msra.mxu0 %v89_v28 }
  0x33   :  { %125 = vmatmul.f32.vlgmr.msra.gmra.mxu0 %v88_v29  ;;  %167 = vmatpush.msra.mxu1 %v132_v32 }
  0x34   :  { %205 = vmatpush.msra.mxu2 %v180_v43 }
  0x36   :  { %206 = vmatpush.msra.mxu2 %v179_v44 }
  0x38   :  { %207 = vmatpush.msra.mxu2 %v178_v45 }
  0x3a   :  { %208 = vmatpush.msra.mxu2 %v177_v51 }
  0x3c   :  { %209 = vmatpush.msra.mxu2 %v176_v52 }
  0x3e   :  { %210 = vmatpush.msra.mxu2 %v175_v53 }
  0xb0   :  { %v126_v47 = vpop.f32.mrf.mxu0 }
  0xb1   :  { %v127_v48 = vadd.f32 %v242_v46, %v126_v47 }
  0xb3   :  { %vm129_vm0 = vcmp.gt.f32.partialorder %v127_v48, 0.0  ;;  %v130_v49 = vmul.f32 0.2, %v127_v48 }
  0xb5   :  { %v131_v50 = vsel %vm129_vm0, %v127_v48, %v130_v49 }
  0xb6   :  { %168 = vmatmul.f32.vlgmr.msra.gmra.mxu1 %v131_v50 }
 0x133   :  { %v169_v55 = vpop.f32.mrf.mxu1 }
 0x134   :  { %v170_v56 = vadd.f32 %v243_v54, %v169_v55 }
 0x136   :  { %vm172_vm1 = vcmp.gt.f32.partialorder %v170_v56, 0.0  ;;  %v173_v57 = vmul.f32 0.2, %v170_v56 }
 0x138   :  { %v174_v58 = vsel %vm172_vm1, %v170_v56, %v173_v57 }
 0x139   :  { %211 = vmatmul.f32.vlgmr.msra.gmra.mxu2 %v174_v58 }
 0x1bc   :  { %v212_v60 = vpop.f32.mrf.mxu2 }
 0x1bd   :  { %v213_v61 = vadd.f32 %v244_v59, %v212_v60 }
 0x1bf   :  { %215 = vst [vmem:[#allocation10] sm:$0xff] %v213_v61 }
 0x1c0   :  { %226 = dma.vmem_to_hbm [thread:$0]  %s222_s25, 128, %s224_s28, [#allocation4]  }
 0x1c1   :  { %371 = dma.done.wait [#allocation4], 128  }
 0x1c2   :  { %372 = vsyncadd [#allocation4], 4294967168 }
 0x1c3   :  { %231 = vsyncpa [#allocation3], 1 }
 0x1c4   :  { %232 = vsyncpa [#allocation6], 1 }
 0x1c5   :  { %233 = vsyncpa [#allocation9], 1 }
 0x1c6   :  { %234 = vsyncpa [#allocation4], 1 }

</bundles_post_ra>
